<compile_context>
chip_gen: v7x
topology: tpu7x:2x2x1
jax: 0.10.0
libtpu: 0.0.40
codegen_flags: <defaults>
</compile_context>

<pallas_src>
import math

import jax
import jax.numpy as jnp
from jax.experimental import pallas as pl
from jax.experimental.pallas import tpu as pltpu


def _pe_add_kernel(pe_ref, x_ref, o_ref):
    # pe_ref: (1, lane) resident row, already in x.dtype.
    # x_ref / o_ref: (tr, lane) streaming tiles.  Pure mem-bound add; the
    # 1-sublane broadcast of pe is XLU work hidden under the HBM stream.
    o_ref[...] = x_ref[...] + pe_ref[...]


def _pe_row(pos: int, d_model: int) -> jax.Array:
    """pe[pos, :] of the PyTorch buffer (even lanes sin, odd lanes cos), f32."""
    half = jnp.arange(0, d_model, 2, dtype=jnp.float32)
    div_term = jnp.exp(half * jnp.float32(-math.log(10000.0) / d_model))
    angle = jnp.float32(pos) * div_term
    return jnp.stack([jnp.sin(angle), jnp.cos(angle)], axis=-1).reshape(d_model)


def positional_encoding_forward(x: jax.Array, max_len: int = 5000) -> jax.Array:
    """x: (batch, seq_len, d_model) -> same shape, x + pe[seq_len] (module semantics)."""
    batch, seq_len, d_model = x.shape
    assert seq_len < max_len, "pe index out of range (matches PyTorch buffer size)"
    assert d_model % 2 == 0, "d_model must be even (as in the reference module)"

    pe_row = _pe_row(seq_len, d_model)  # (d_model,) f32, computed once (hoisted)

    itemsize = jnp.dtype(x.dtype).itemsize
    granule = max(8, 32 // itemsize)  # sublane granule: 8 f32, 16 bf16, 32 int8/fp8

    # ---- lane-dense packing: make the lane dim a multiple of 128, always.
    # The pe row is constant across positions, so folding `fold` consecutive
    # positions into the lane dim and tiling the pe row `fold` times is legal.
    fold = 1 if d_model % 128 == 0 else 128 // math.gcd(d_model, 128)
    lane = d_model * fold

    rows_total = batch * seq_len
    x2 = x.reshape(rows_total, d_model)
    pad_rows = (-rows_total) % fold
    if pad_rows:
        # Pad with garbage rows instead of dropping to a sub-128-lane layout.
        # TODO(synk): jnp.pad implies one extra copy of x in XLA; only hit when
        # batch*seq_len is not a multiple of the fold factor.
        x2 = jnp.pad(x2, ((0, pad_rows), (0, 0)))
    rows = (rows_total + pad_rows) // fold
    x2 = x2.reshape(rows, lane)

    # pe pre-cast to x.dtype in the wrapper (no per-grid-step convert in-kernel).
    # NOTE: for sub-f32 inputs the add/output stay in x.dtype, unlike PyTorch's
    # f32 type-promotion; identical for f32 inputs (the tested path).
    pe2 = jnp.tile(pe_row, (fold,)).reshape(1, lane).astype(x.dtype)

    # ---- row-tile size: ~4 MiB of input per block (review: 2-4 MiB v6e/v5e,
    # 4-8 MiB v7x), sublane-granule aligned, with the grid kept >= ~8 steps so
    # the "parallel" axis still spans both TensorCores on megacore chips.
    bytes_per_row = lane * itemsize
    if rows <= granule:
        tr = rows  # full extent (satisfies the (8,128) rule)
    else:
        target = 4 << 20
        tr = max(granule, (target // bytes_per_row) // granule * granule)
        if rows >= 8 * granule:
            cap = max(granule, (rows // 8) // granule * granule)  # >= ~8 grid steps
            tr = min(tr, cap)
        tr = min(tr, (rows // granule) * granule)
        if rows % tr != 0:
            # Prefer a nearby divisor of `rows` so the last tile isn't masked.
            for cand in range(tr, granule - 1, -granule):
                if rows % cand == 0:
                    if cand * 2 >= tr:
                        tr = cand
                    break

    grid = (pl.cdiv(rows, tr),)

    out2 = pl.pallas_call(
        _pe_add_kernel,
        out_shape=jax.ShapeDtypeStruct((rows, lane), x.dtype),
        grid=grid,
        in_specs=[
            pl.BlockSpec((1, lane), lambda i: (0, 0)),    # pe row, resident across grid
            pl.BlockSpec((tr, lane), lambda i: (i, 0)),   # streaming x tile
        ],
        out_specs=pl.BlockSpec((tr, lane), lambda i: (i, 0)),
        compiler_params=pltpu.CompilerParams(
            # Independent row tiles -> shard across TensorCores on megacore chips.
            dimension_semantics=("parallel",),
            # 2 x (4 MiB in + 4 MiB out) + pe + slack; <= 64 MiB physical on v7x,
            # and lifts v5e's 16 MiB scoped default so the 4 MiB sweep applies.
            vmem_limit_bytes=48 << 20,
        ),
    )(pe2, x2)

    out = out2.reshape(rows * fold, d_model)
    if pad_rows:
        out = out[:rows_total]
    return out.reshape(batch, seq_len, d_model)


def _reference(x: jax.Array, max_len: int = 5000) -> jax.Array:
    """Pure-JAX reference mirroring the PyTorch module (buffer built eagerly)."""
    _, seq_len, d_model = x.shape
    position = jnp.arange(max_len, dtype=jnp.float32)[:, None]
    div_term = jnp.exp(
        jnp.arange(0, d_model, 2, dtype=jnp.float32) * (-math.log(10000.0) / d_model)
    )
    pe = jnp.zeros((max_len, d_model), dtype=jnp.float32)
    pe = pe.at[:, 0::2].set(jnp.sin(position * div_term))
    pe = pe.at[:, 1::2].set(jnp.cos(position * div_term))
    pe = pe[None]  # (1, max_len, d_model)
    return x + pe[:, seq_len, :]


if __name__ == "__main__":
    key = jax.random.PRNGKey(0)
    k0, k1, k2 = jax.random.split(key, 3)

    # Small shape matching the module's expected layout (batch, seq_len, d_model).
    batch, seq_len, d_model = 2, 8, 32
    x_small = jax.random.normal(k0, (batch, seq_len, d_model), dtype=jnp.float32)
    out_small = jax.block_until_ready(positional_encoding_forward(x_small))
    assert out_small.shape == (batch, seq_len, d_model)
    assert jnp.allclose(out_small, _reference(x_small), atol=1e-5, rtol=1e-5), "mismatch (small)"

    # Medium shape: exercises the multi-step pipelined path (8 grid steps, 1 MiB+ tiles).
    x_big = jax.random.normal(k1, (8, 512, 512), dtype=jnp.float32)
    out_big = jax.block_until_ready(positional_encoding_forward(x_big))
    assert jnp.allclose(out_big, _reference(x_big), atol=1e-5, rtol=1e-5), "mismatch (big)"

    # Small-d_model shape where batch*seq_len is NOT a multiple of the fold
    # factor: exercises the lane-dense pad/slice path (no sub-128-lane fallback).
    x_pad = jax.random.normal(k2, (3, 7, 32), dtype=jnp.float32)
    out_pad = jax.block_until_ready(positional_encoding_forward(x_pad))
    assert jnp.allclose(out_pad, _reference(x_pad), atol=1e-5, rtol=1e-5), "mismatch (pad)"

    print("KERNEL_OK")
</pallas_src>

<mosaic_0001>
module attributes {stable_mosaic.version = 11 : i64} {
  func.func @_pe_add_kernel(%arg0: i32, %arg1: memref<1x128xf32, #tpu.memory_space<vmem>>, %arg2: memref<4x128xf32, #tpu.memory_space<vmem>>, %arg3: memref<4x128xf32, #tpu.memory_space<vmem>>) attributes {dimension_semantics = [#tpu.dimension_semantics<parallel>], iteration_bounds = array<i64: 1>, scalar_prefetch = 0 : i64, scratch_operands = 0 : i64, tpu.core_type = #tpu.core_type<tc>, window_params = [{pipeline_mode = #tpu.pipeline_mode<synchronous>, transform_indices = @transform_0, window_bounds = array<i64: 1, 128>}, {transform_indices = @transform_1, window_bounds = array<i64: 4, 128>}, {transform_indices = @transform_2, window_bounds = array<i64: 4, 128>}]} {
    %c0 = arith.constant 0 : index
    %c0_0 = arith.constant 0 : index
    %0 = vector.load %arg2[%c0, %c0_0] : memref<4x128xf32, #tpu.memory_space<vmem>>, vector<4x128xf32>
    %c0_1 = arith.constant 0 : index
    %c0_2 = arith.constant 0 : index
    %1 = vector.load %arg1[%c0_1, %c0_2] : memref<1x128xf32, #tpu.memory_space<vmem>>, vector<1x128xf32>
    %2 = vector.broadcast %1 : vector<1x128xf32> to vector<4x128xf32>
    %3 = arith.addf %0, %2 : vector<4x128xf32>
    %c0_3 = arith.constant 0 : index
    %c0_4 = arith.constant 0 : index
    %4 = vector.load %arg3[%c0_3, %c0_4] : memref<4x128xf32, #tpu.memory_space<vmem>>, vector<4x128xf32>
    tpu.vector_store %arg3[%c0_3, %c0_4], %3 {strides = array<i32>} : memref<4x128xf32, #tpu.memory_space<vmem>>, vector<4x128xf32>,
    return
  }
  func.func @transform_0(%arg0: i32) -> (i32, i32) {
    %c0_i32 = arith.constant 0 : i32
    %c0_i32_0 = arith.constant 0 : i32
    %c0_i32_1 = arith.constant 0 : i32
    return %c0_i32, %c0_i32_0 : i32, i32
  }
  func.func @transform_1(%arg0: i32) -> (i32, i32) {
    %c0_i32 = arith.constant 0 : i32
    %c0_i32_0 = arith.constant 0 : i32
    return %arg0, %c0_i32 : i32, i32
  }
  func.func @transform_2(%arg0: i32) -> (i32, i32) {
    %c0_i32 = arith.constant 0 : i32
    %c0_i32_0 = arith.constant 0 : i32
    return %arg0, %c0_i32 : i32, i32
  }
}

</mosaic_0001>

<bundles_post_ra>
// kernel: tpu_custom_call.1
= control target key start
LH: loop header
LB: loop body
LE: loop exit
PB: predicated region body
PF: predicated region fallthrough
CT: control target
= control target key end

     0   :  { %7 = vsyncpa [#allocation3], 0  ;;  %s192_s0 = inlined_call_operand.hbm [shape: f32[1,128], index: 0, kind: input, shape index: {}]   ;;  %s193_s1 = inlined_call_operand.hbm [shape: f32[4,128], index: 1, kind: input, shape index: {}]   ;;  %s194_s2 = inlined_call_operand.hbm [shape: f32[4,128], index: 2, kind: output, shape index: {}]  }
   0x1   :  { %8 = vsyncpa [#allocation6], 0 }
   0x2   :  { %9 = vsyncpa [#allocation4], 0  ;;  %s138_s9 = smov [#allocation2]   ;;  %s139_s11 = smov [#allocation5]  }
   0x3   :  { %s16_s10 = sshll.u32 %s138_s9, 4  ;;  %s26_s12 = sshll.u32 %s139_s11, 4  ;;  %s17_s10 = int_to_ptr.vmem [resolvable:$true] %s16_s10  ;;  %s27_s12 = int_to_ptr.vmem [resolvable:$true] %s26_s12 }
   0x4   :  { %s66_s15 = scalar_lea.hbm %s192_s0, 16 }
   0x5   :  { %p67_p0 = scmp.ne.s32.totalorder %s192_s0, %s66_s15  ;;  %p70_p1 = scmp.lt.u32.totalorder %s66_s15, %s192_s0 }
   0x7   :  { %p72_p2 = pnand %p70_p1, %p67_p0 }
   0x9   :  { %75 = shalt.err (!%p72_p2)
}
   0xa   :  { %s76_s20 = scalar_lea.vmem %s17_s10, 16  ;;  %s80_s21 = scalar_lea.vmem %s17_s10, 32 }
   0xb   :  { %p77_p3 = scmp.ne.s32.totalorder %s17_s10, %s76_s20  ;;  %p81_p4 = scmp.lt.s32.totalorder %s17_s10, %s17_s10 }
   0xc   :  { %p82_p5 = scmp.lt.s32.totalorder %s80_s21, %s76_s20 }
   0xe   :  { %p83_p6 = por %p82_p5, %p81_p4 }
  0x10   :  { %p84_p7 = pnand %p83_p6, %p77_p3 }
  0x12   :  { %87 = shalt.err (!%p84_p7)
}
  0x13   :  { %19 = dma.hbm_to_vmem [thread:$0]  %s192_s0, 16, %s17_s10, [#allocation3]  }
  0x14   :  { %s88_s26 = scalar_lea.hbm %s193_s1, 64 }
  0x15   :  { %p89_p8 = scmp.ne.s32.totalorder %s193_s1, %s88_s26  ;;  %p92_p9 = scmp.lt.u32.totalorder %s88_s26, %s193_s1 }
  0x17   :  { %p94_p10 = pnand %p92_p9, %p89_p8 }
  0x19   :  { %97 = shalt.err (!%p94_p10)
}
  0x1a   :  { %s98_s3 = scalar_lea.vmem %s27_s12, 64  ;;  %p103_p12 = scmp.lt.s32.totalorder %s27_s12, %s27_s12 }
  0x1b   :  { %p99_p11 = scmp.ne.s32.totalorder %s27_s12, %s98_s3  ;;  %p104_p13 = scmp.lt.s32.totalorder %s98_s3, %s98_s3 }
  0x1d   :  { %p105_p0 = por %p104_p13, %p103_p12 }
  0x1f   :  { %p106_p1 = pnand %p105_p0, %p99_p11 }
  0x21   :  { %109 = shalt.err (!%p106_p1)
}
  0x22   :  { %29 = dma.hbm_to_vmem [thread:$0]  %s193_s1, 64, %s27_s12, [#allocation6]  }
  0x23   :  { %132 = dma.done.wait [#allocation3], 16  }
  0x24   :  { %133 = vsyncadd [#allocation3], 4294967280 }
  0x25   :  { %134 = dma.done.wait [#allocation6], 64  }
  0x26   :  { %135 = vsyncadd [#allocation6], 4294967232  ;;  %s140_s5 = smov [#allocation7]   ;;  %v36_v0 = vld [vmem:[#allocation5] sm:$0xf] }
  0x27   :  { %s52_s6 = sshll.u32 %s140_s5, 4  ;;  %v62_v1 = vld [vmem:[#allocation2] ss:$0 sm:$0xff]  ;;  %s53_s6 = int_to_ptr.vmem [resolvable:$true] %s52_s6 }
  0x28   :  { %v44_v2 = vadd.f32 %v62_v1, %v36_v0  ;;  %s110_s7 = scalar_lea.vmem %s53_s6, 64  ;;  %p115_p3 = scmp.lt.s32.totalorder %s53_s6, %s53_s6 }
  0x29   :  { %p111_p2 = scmp.ne.s32.totalorder %s53_s6, %s110_s7  ;;  %p116_p4 = scmp.lt.s32.totalorder %s110_s7, %s110_s7 }
  0x2a   :  { %45 = vst [vmem:[#allocation7] sm:$0xf] %v44_v2 }
  0x2b   :  { %p117_p5 = por %p116_p4, %p115_p3 }
  0x2d   :  { %p118_p6 = pnand %p117_p5, %p111_p2 }
  0x2f   :  { %121 = shalt.err (!%p118_p6)
}
  0x30   :  { %s122_s9 = scalar_lea.hbm %s194_s2, 64 }
  0x31   :  { %p123_p7 = scmp.ne.s32.totalorder %s194_s2, %s122_s9  ;;  %p126_p8 = scmp.lt.u32.totalorder %s122_s9, %s194_s2 }
  0x33   :  { %p128_p9 = pnand %p126_p8, %p123_p7 }
  0x35   :  { %131 = shalt.err (!%p128_p9)
}
  0x36   :  { %55 = dma.vmem_to_hbm [thread:$0]  %s53_s6, 64, %s194_s2, [#allocation4]  }
  0x37   :  { %136 = dma.done.wait [#allocation4], 64  }
  0x38   :  { %137 = vsyncadd [#allocation4], 4294967232 }
  0x39   :  { %59 = vsyncpa [#allocation3], 1 }
  0x3a   :  { %60 = vsyncpa [#allocation6], 1 }
  0x3b   :  { %61 = vsyncpa [#allocation4], 1 }

</bundles_post_ra>
